<compile_context>
chip_gen: v6e
topology: v6e:2x2x1
jax: 0.10.0
libtpu: 0.0.40
codegen_flags: <defaults>
</compile_context>

<pallas_src>
import jax
import jax.numpy as jnp
from jax import lax
from jax.experimental import pallas as pl
from jax.experimental.pallas import tpu as pltpu


# ---------------------------------------------------------------------------
# Kernels
# ---------------------------------------------------------------------------

def odefunc_kernel(zT_ref, w2_ref, vec_ref, yp_ref):
    # zT_ref : (2, B_BLK)  — state, batch on lanes
    # w2_ref : (32, 32)    — layer-2 weight, (out, in) layout (resident)
    # vec_ref: (32, 8)     — packed small params (resident):
    #          col 0: w1[:,0]  col 1: w1[:,1]  col 2: b1
    #          col 3: b2       col 4: w3[0,:]  col 5[row 0]: b3
    # yp_ref : (1, B_BLK)  — y' = net(z) only; dx/dt = 1 handled by the caller.
    zT = zT_ref[...]
    x = zT[0:1, :]                         # (1, B)
    y = zT[1:2, :]                         # (1, B)

    w1c0 = vec_ref[:, 0:1]                 # (32, 1)
    w1c1 = vec_ref[:, 1:2]
    b1   = vec_ref[:, 2:3]
    b2   = vec_ref[:, 3:4]
    w3t  = vec_ref[:, 4:5]
    b3   = vec_ref[0:1, 5:6]               # (1, 1)

    # Layer 1: Linear(2, 32) + ReLU on the VPU (two broadcast FMAs).
    h1 = jnp.maximum(w1c0 * x + w1c1 * y + b1, 0.0)                    # (32, B)
    # Layer 2: Linear(32, 32) + ReLU on the MXU (lane-dense N = B_BLK).
    h2 = jnp.dot(w2_ref[...], h1, preferred_element_type=jnp.float32) + b2
    h2 = jnp.maximum(h2, 0.0)                                          # (32, B)
    # Layer 3: Linear(32, 1) on VPU + 32-sublane XLU reduce.
    yp = jnp.sum(w3t * h2, axis=0, keepdims=True) + b3                 # (1, B)

    yp_ref[...] = yp.astype(yp_ref.dtype)


def make_euler_kernel(n_steps, dt):
    """Fused explicit-Euler integrator: z stays on-chip across all steps."""
    dt = float(dt)

    def euler_kernel(zT_ref, w2_ref, vec_ref, out_ref):
        zT = zT_ref[...]
        x0 = zT[0:1, :]
        y0 = zT[1:2, :]

        w1c0 = vec_ref[:, 0:1]
        w1c1 = vec_ref[:, 1:2]
        b1   = vec_ref[:, 2:3]
        b2   = vec_ref[:, 3:4]
        w3t  = vec_ref[:, 4:5]
        b3   = vec_ref[0:1, 5:6]
        w2 = w2_ref[...]

        def step(_, carry):
            x, y = carry
            h1 = jnp.maximum(w1c0 * x + w1c1 * y + b1, 0.0)
            h2 = jnp.maximum(
                jnp.dot(w2, h1, preferred_element_type=jnp.float32) + b2, 0.0)
            yp = jnp.sum(w3t * h2, axis=0, keepdims=True) + b3
            # dx/dt = 1 handled analytically; only y' needs the network.
            return (x + dt, y + dt * yp)

        xf, yf = lax.fori_loop(0, n_steps, step, (x0, y0))
        out_ref[...] = jnp.concatenate([xf, yf], axis=0).astype(out_ref.dtype)

    return euler_kernel


# ---------------------------------------------------------------------------
# Blocking / parameter packing helpers
# ---------------------------------------------------------------------------

def _pick_blocking(batch, *, max_block_lanes=32, want_two_blocks=True):
    """Choose (b_grid, block_b, n_blocks).

    - Pads the batch to a multiple of 128 lanes only; any extra padding to make
      the grid exact is bounded by n_blocks*128 lanes (tiny), not block_b.
    - Caps blocks at max_block_lanes*128 columns (default 4096; sweep 2048-8192
      if profiling shows per-step overhead still dominates, cap lower only if
      bundle dumps show vld/vst spill pressure).
    - Keeps >= 2 blocks whenever possible so v7x's two TensorCores both get
      work under dimension_semantics=("parallel",). On v5e/v6e the extra grid
      step costs ~0.35 us — negligible.
    """
    lanes = pl.cdiv(batch, 128)
    n_blocks = pl.cdiv(lanes, max_block_lanes)
    if want_two_blocks and lanes >= 2:
        n_blocks = max(n_blocks, 2)
    block_lanes = pl.cdiv(lanes, n_blocks)
    n_blocks = pl.cdiv(lanes, block_lanes)
    block_b = block_lanes * 128
    return block_b * n_blocks, block_b, n_blocks


def pack_params(params):
    """Pack the six tiny tensors into (W2 (32,32), vec (32,8)) resident slabs.

    Call once and reuse across forward calls / integrator steps so the packing
    XLA ops are not re-emitted per call.
    """
    w1, b1, w2, b2, w3, b3 = params        # PyTorch layout: W (out, in), b (out,)
    vec = jnp.zeros((32, 8), jnp.float32)
    vec = vec.at[:, 0].set(w1[:, 0].astype(jnp.float32))
    vec = vec.at[:, 1].set(w1[:, 1].astype(jnp.float32))
    vec = vec.at[:, 2].set(b1.astype(jnp.float32))
    vec = vec.at[:, 3].set(b2.astype(jnp.float32))
    vec = vec.at[:, 4].set(w3[0, :].astype(jnp.float32))
    vec = vec.at[0, 5].set(b3[0].astype(jnp.float32))
    return w2.astype(jnp.float32), vec


def _specs(block_b):
    in_specs = [
        pl.BlockSpec((2, block_b), lambda i: (0, i)),    # z block (streamed)
        pl.BlockSpec((32, 32), lambda i: (0, 0)),        # W2 (resident)
        pl.BlockSpec((32, 8), lambda i: (0, 0)),         # packed params (resident)
    ]
    return in_specs


# ---------------------------------------------------------------------------
# Lane-major cores (use these directly from an integrator to avoid transposes)
# ---------------------------------------------------------------------------

def odefunc_yprime_lane_major(zT, w2_f32, vec, *, block_b, n_blocks):
    """zT: (2, b_grid) lane-major state, b_grid == block_b * n_blocks.
    Returns y' = net(z) with shape (1, b_grid)."""
    b_grid = zT.shape[1]
    assert b_grid == block_b * n_blocks
    flops = 2 * b_grid * (2 * 32 + 32 * 32 + 32 * 1)
    bytes_accessed = 4 * (2 * b_grid + 1 * b_grid + 32 * 32 + 32 * 8)
    return pl.pallas_call(
        odefunc_kernel,
        out_shape=jax.ShapeDtypeStruct((1, b_grid), jnp.float32),
        grid_spec=pltpu.PrefetchScalarGridSpec(
            num_scalar_prefetch=0,
            grid=(n_blocks,),
            in_specs=_specs(block_b),
            out_specs=pl.BlockSpec((1, block_b), lambda i: (0, i)),
        ),
        compiler_params=pltpu.CompilerParams(
            dimension_semantics=("parallel",),   # v7x: batch blocks across both TCs
        ),
        cost_estimate=pl.CostEstimate(
            flops=flops, transcendentals=0, bytes_accessed=bytes_accessed),
    )(zT, w2_f32, vec)


def odefunc_euler_lane_major(zT, w2_f32, vec, *, n_steps, dt, block_b, n_blocks):
    """Fused Euler loop in one pallas_call: state stays on-chip for all steps,
    HBM sees one read and one write of the (2, b_grid) state."""
    b_grid = zT.shape[1]
    assert b_grid == block_b * n_blocks
    flops = 2 * b_grid * (2 * 32 + 32 * 32 + 32 * 1) * n_steps
    bytes_accessed = 4 * (2 * b_grid + 2 * b_grid + 32 * 32 + 32 * 8)
    return pl.pallas_call(
        make_euler_kernel(n_steps, dt),
        out_shape=jax.ShapeDtypeStruct((2, b_grid), jnp.float32),
        grid_spec=pltpu.PrefetchScalarGridSpec(
            num_scalar_prefetch=0,
            grid=(n_blocks,),
            in_specs=_specs(block_b),
            out_specs=pl.BlockSpec((2, block_b), lambda i: (0, i)),
        ),
        compiler_params=pltpu.CompilerParams(
            dimension_semantics=("parallel",),
        ),
        cost_estimate=pl.CostEstimate(
            flops=flops, transcendentals=0, bytes_accessed=bytes_accessed),
    )(zT, w2_f32, vec)


# ---------------------------------------------------------------------------
# PyTorch-layout wrappers
# ---------------------------------------------------------------------------

def odefunc_forward(t, z, params, *, max_block_lanes=32):
    """ODEFunc.forward(t, z): returns cat([ones_like(x), net(z)], dim=1), shape (B, 2).

    # TODO(synk): when driving a solver, use odefunc_euler_lane_major (or keep
    # the state in the lane-major (2, B_pad) layout across steps and call
    # odefunc_yprime_lane_major) to avoid these per-call transpose/pad ops.
    """
    del t  # the PyTorch module ignores t
    B = z.shape[0]
    b_grid, block_b, n_blocks = _pick_blocking(B, max_block_lanes=max_block_lanes)
    w2_f32, vec = pack_params(params)

    # One padded transpose into lane-major layout.
    zT = jnp.pad(z.astype(jnp.float32).T, ((0, 0), (0, b_grid - B)))
    ypT = odefunc_yprime_lane_major(zT, w2_f32, vec,
                                    block_b=block_b, n_blocks=n_blocks)

    # dx/dt = 1 attached here (kernel only emits y'), padded lanes dropped.
    y_prime = ypT[0, :B][:, None]
    out = jnp.concatenate([jnp.ones((B, 1), jnp.float32), y_prime], axis=1)
    return out.astype(z.dtype)


def odefunc_euler_integrate(z0, params, *, n_steps, dt, max_block_lanes=32):
    """Explicit Euler: z_{k+1} = z_k + dt * ODEFunc(t_k, z_k), fused into one
    pallas_call. Returns the final state, shape (B, 2)."""
    B = z0.shape[0]
    b_grid, block_b, n_blocks = _pick_blocking(B, max_block_lanes=max_block_lanes)
    w2_f32, vec = pack_params(params)
    zT = jnp.pad(z0.astype(jnp.float32).T, ((0, 0), (0, b_grid - B)))
    zT_final = odefunc_euler_lane_major(zT, w2_f32, vec, n_steps=n_steps, dt=dt,
                                        block_b=block_b, n_blocks=n_blocks)
    return zT_final[:, :B].T.astype(z0.dtype)


# ---------------------------------------------------------------------------
# Reference / init
# ---------------------------------------------------------------------------

def init_params(key):
    """torch.nn.Linear default init (U[-1/sqrt(fan_in), 1/sqrt(fan_in)]), PyTorch layout."""
    def linear(k, fan_in, fan_out):
        kw, kb = jax.random.split(k)
        bound = 1.0 / jnp.sqrt(jnp.float32(fan_in))
        w = jax.random.uniform(kw, (fan_out, fan_in), jnp.float32, -bound, bound)
        b = jax.random.uniform(kb, (fan_out,), jnp.float32, -bound, bound)
        return w, b

    k1, k2, k3 = jax.random.split(key, 3)
    w1, b1 = linear(k1, 2, 32)
    w2, b2 = linear(k2, 32, 32)
    w3, b3 = linear(k3, 32, 1)
    return (w1, b1, w2, b2, w3, b3)


def odefunc_reference(t, z, params):
    """Pure-JAX reference mirroring the PyTorch module."""
    del t
    w1, b1, w2, b2, w3, b3 = params
    h1 = jnp.maximum(z @ w1.T + b1, 0.0)
    h2 = jnp.maximum(h1 @ w2.T + b2, 0.0)
    y_prime = h2 @ w3.T + b3
    return jnp.concatenate([jnp.ones_like(y_prime), y_prime], axis=1)


def euler_reference(z0, params, *, n_steps, dt):
    z = z0.astype(jnp.float32)
    for _ in range(n_steps):
        z = z + dt * odefunc_reference(0.0, z, params)
    return z


if __name__ == "__main__":
    key = jax.random.PRNGKey(0)
    k_params, k_z = jax.random.split(key)

    params = init_params(k_params)

    # Non-multiple of 128: exercises the 128-lane pad and a 2-block grid
    # (b_grid = 1024, block_b = 512, n_blocks = 2).
    B = 1000
    z = jax.random.normal(k_z, (B, 2), dtype=jnp.float32)
    t = jnp.float32(0.0)  # unused by forward (matches the PyTorch module)

    # --- single forward pass ---
    out = jax.block_until_ready(odefunc_forward(t, z, params))
    ref = odefunc_reference(t, z, params)
    assert out.shape == (B, 2), out.shape
    assert jnp.allclose(out, ref, atol=1e-5, rtol=1e-5), float(
        jnp.max(jnp.abs(out - ref)))

    # --- fused Euler integrator (state resident on-chip across steps) ---
    n_steps, dt = 8, 0.05
    z_final = jax.block_until_ready(
        odefunc_euler_integrate(z, params, n_steps=n_steps, dt=dt))
    z_ref = euler_reference(z, params, n_steps=n_steps, dt=dt)
    assert z_final.shape == (B, 2), z_final.shape
    assert jnp.allclose(z_final, z_ref, atol=1e-4, rtol=1e-4), float(
        jnp.max(jnp.abs(z_final - z_ref)))

    print("KERNEL_OK")
</pallas_src>

<mosaic_0001>
module attributes {stable_mosaic.version = 11 : i64} {
  func.func @odefunc_kernel(%arg0: i32, %arg1: memref<2x512xf32, #tpu.memory_space<vmem>>, %arg2: memref<32x32xf32, #tpu.memory_space<vmem>>, %arg3: memref<32x8xf32, #tpu.memory_space<vmem>>, %arg4: memref<1x512xf32, #tpu.memory_space<vmem>>) attributes {dimension_semantics = [#tpu.dimension_semantics<parallel>], iteration_bounds = array<i64: 2>, scalar_prefetch = 0 : i64, scratch_operands = 0 : i64, tpu.core_type = #tpu.core_type<tc>, window_params = [{transform_indices = @transform_0, window_bounds = array<i64: 2, 512>}, {pipeline_mode = #tpu.pipeline_mode<synchronous>, transform_indices = @transform_1, window_bounds = array<i64: 32, 32>}, {pipeline_mode = #tpu.pipeline_mode<synchronous>, transform_indices = @transform_2, window_bounds = array<i64: 32, 8>}, {transform_indices = @transform_3, window_bounds = array<i64: 1, 512>}]} {
    %c0 = arith.constant 0 : index
    %c0_0 = arith.constant 0 : index
    %0 = vector.load %arg1[%c0, %c0_0] : memref<2x512xf32, #tpu.memory_space<vmem>>, vector<2x512xf32>
    %1 = vector.extract_strided_slice %0 {offsets = [0, 0], sizes = [1, 512], strides = [1, 1]} : vector<2x512xf32> to vector<1x512xf32>
    %2 = vector.extract_strided_slice %0 {offsets = [1, 0], sizes = [1, 512], strides = [1, 1]} : vector<2x512xf32> to vector<1x512xf32>
    %c0_1 = arith.constant 0 : index
    %c0_2 = arith.constant 0 : index
    %3 = vector.load %arg3[%c0_1, %c0_2] : memref<32x8xf32, #tpu.memory_space<vmem>>, vector<32x1xf32>
    %c0_3 = arith.constant 0 : index
    %c1 = arith.constant 1 : index
    %4 = vector.load %arg3[%c0_3, %c1] : memref<32x8xf32, #tpu.memory_space<vmem>>, vector<32x1xf32>
    %c0_4 = arith.constant 0 : index
    %c2 = arith.constant 2 : index
    %5 = vector.load %arg3[%c0_4, %c2] : memref<32x8xf32, #tpu.memory_space<vmem>>, vector<32x1xf32>
    %c0_5 = arith.constant 0 : index
    %c3 = arith.constant 3 : index
    %6 = vector.load %arg3[%c0_5, %c3] : memref<32x8xf32, #tpu.memory_space<vmem>>, vector<32x1xf32>
    %c0_6 = arith.constant 0 : index
    %c4 = arith.constant 4 : index
    %7 = vector.load %arg3[%c0_6, %c4] : memref<32x8xf32, #tpu.memory_space<vmem>>, vector<32x1xf32>
    %c0_7 = arith.constant 0 : index
    %c5 = arith.constant 5 : index
    %8 = vector.load %arg3[%c0_7, %c5] : memref<32x8xf32, #tpu.memory_space<vmem>>, vector<1x1xf32>
    %9 = vector.broadcast %3 : vector<32x1xf32> to vector<32x512xf32>
    %10 = vector.broadcast %1 : vector<1x512xf32> to vector<32x512xf32>
    %11 = arith.mulf %9, %10 : vector<32x512xf32>
    %12 = vector.broadcast %4 : vector<32x1xf32> to vector<32x512xf32>
    %13 = vector.broadcast %2 : vector<1x512xf32> to vector<32x512xf32>
    %14 = arith.mulf %12, %13 : vector<32x512xf32>
    %15 = arith.addf %11, %14 : vector<32x512xf32>
    %16 = vector.broadcast %5 : vector<32x1xf32> to vector<32x512xf32>
    %17 = arith.addf %15, %16 : vector<32x512xf32>
    %cst = arith.constant 0.000000e+00 : f32
    %18 = vector.broadcast %cst : f32 to vector<32x512xf32>
    %19 = arith.maximumf %17, %18 : vector<32x512xf32>
    %c0_8 = arith.constant 0 : index
    %c0_9 = arith.constant 0 : index
    %20 = vector.load %arg2[%c0_8, %c0_9] : memref<32x32xf32, #tpu.memory_space<vmem>>, vector<32x32xf32>
    %cst_10 = arith.constant dense<0.000000e+00> : vector<32x512xf32>
    %21 = tpu.matmul %20, %19, %cst_10 {dimension_numbers = #tpu.dot_dimension_numbers<[1], [0], [0], [1], [0, 0, 1, 1], [], []>} : vector<32x32xf32>, vector<32x512xf32>, vector<32x512xf32> -> vector<32x512xf32>
    %22 = vector.broadcast %6 : vector<32x1xf32> to vector<32x512xf32>
    %23 = arith.addf %21, %22 : vector<32x512xf32>
    %cst_11 = arith.constant 0.000000e+00 : f32
    %24 = vector.broadcast %cst_11 : f32 to vector<32x512xf32>
    %25 = arith.maximumf %23, %24 : vector<32x512xf32>
    %26 = vector.broadcast %7 : vector<32x1xf32> to vector<32x512xf32>
    %27 = arith.mulf %26, %25 : vector<32x512xf32>
    %cst_12 = arith.constant dense<0.000000e+00> : vector<512xf32>
    %28 = vector.multi_reduction <add>, %27, %cst_12 [0] : vector<32x512xf32> to vector<512xf32>
    %29 = vector.shape_cast %28 : vector<512xf32> to vector<1x512xf32>
    %30 = vector.broadcast %8 : vector<1x1xf32> to vector<1x512xf32>
    %31 = arith.addf %29, %30 : vector<1x512xf32>
    %c0_13 = arith.constant 0 : index
    %c0_14 = arith.constant 0 : index
    %32 = vector.load %arg4[%c0_13, %c0_14] : memref<1x512xf32, #tpu.memory_space<vmem>>, vector<1x512xf32>
    tpu.vector_store %arg4[%c0_13, %c0_14], %31 {strides = array<i32>} : memref<1x512xf32, #tpu.memory_space<vmem>>, vector<1x512xf32>,
    return
  }
  func.func @transform_0(%arg0: i32) -> (i32, i32) {
    %c0_i32 = arith.constant 0 : i32
    %c0_i32_0 = arith.constant 0 : i32
    return %c0_i32, %arg0 : i32, i32
  }
  func.func @transform_1(%arg0: i32) -> (i32, i32) {
    %c0_i32 = arith.constant 0 : i32
    %c0_i32_0 = arith.constant 0 : i32
    %c0_i32_1 = arith.constant 0 : i32
    return %c0_i32, %c0_i32_0 : i32, i32
  }
  func.func @transform_2(%arg0: i32) -> (i32, i32) {
    %c0_i32 = arith.constant 0 : i32
    %c0_i32_0 = arith.constant 0 : i32
    %c0_i32_1 = arith.constant 0 : i32
    return %c0_i32, %c0_i32_0 : i32, i32
  }
  func.func @transform_3(%arg0: i32) -> (i32, i32) {
    %c0_i32 = arith.constant 0 : i32
    %c0_i32_0 = arith.constant 0 : i32
    return %c0_i32, %arg0 : i32, i32
  }
}

</mosaic_0001>

<bundles_post_ra>
// kernel: tpu_custom_call.1
= control target key start
LH: loop header
LB: loop body
LE: loop exit
PB: predicated region body
PF: predicated region fallthrough
CT: control target
= control target key end

     0   :  { %8 = vsyncpa [#allocation3], 0  ;;  %s1247_s0 = inlined_call_operand.hbm [shape: f32[2,1024], index: 0, kind: input, shape index: {}]   ;;  %s1248_s1 = inlined_call_operand.vmem [shape: f32[32,32], index: 1, kind: input, shape index: {}]   ;;  %s1249_s2 = inlined_call_operand.vmem [shape: f32[32,8], index: 2, kind: input, shape index: {}]   ;;  %s1250_s3 = inlined_call_operand.hbm [shape: f32[1,1024], index: 3, kind: output, shape index: {}]  }
   0x1   :  { %10 = vsyncpa [#allocation3 + $0x1], 0 }
   0x2   :  { %11 = vsyncpa [#allocation4], 0 }
   0x3   :  { %13 = vsyncpa [#allocation4 + $0x1], 0  ;;  %s1040_s12 = smov 0   ;;  %s1042_s13 = smov 0  }
   0x4   :  { %s1044_s14 = smov 0   ;;  %s1046_s15 = smov 0  }
   0x5 LB: > { %s1061_s16 = sadd.s32 4294967295, %s1008_s15   ;;  %s823_s17 = sadd.s32 4294967294, %s1008_s15   ;;  %s1008_s15 = sphi %s1046_s15, %s1267_s15   ;;  %s1004_s14 = sphi %s1044_s14, %s1266_s14   ;;  %s1000_s13 = sphi %s1042_s13, %s1265_s13   ;;  %s996_s12 = sphi %s1040_s12, %s1264_s12  }
   0x6   : > { %s1065_s18 = sadd.s32 1, %s1008_s15   ;;  %s26_s19 = sadd.s32 1, %s1004_s14 }
   0x7   : > { %s23_s20 = ssub.s32 %s1008_s15, %s1065_s18  ;;  %p33_p0 = scmp.ne.s32.totalorder %s1004_s14, %s1000_s13 }
   0x8   : > { %p24_p1 = scmp.eq.s32.totalorder %s23_s20, 0  ;;  %p34_p2 = scmp.eq.s32.totalorder %s1008_s15, 0 }
   0x9   : > { %p39_p3 = scmp.ne.s32.totalorder %s1000_s13, %s996_s12  ;;  %p40_p4 = scmp.eq.s32.totalorder %s1061_s16, 0 }
   0xa   : > { %s1077_s21 = scalar_select %p24_p1, %s1004_s14, %s26_s19  }
   0xb   : > { %p1079_p5 = por %p34_p2, %p33_p0  ;;  %p1083_p6 = por %p40_p4, %p39_p3 }
   0xc   : > { %p105_p7 = scmp.eq.s32.totalorder %s1061_s16, 1  ;;  %p111_p8 = scmp.eq.s32.totalorder %s823_s17, 1 }
   0xd   : > { %s1254_s23 = scalar_select %p1083_p6, 1, 0 }
   0xe   : > { %p859_p10 = scmp.lt.s32.totalorder %s1008_s15, 2  ;;  %p1090_p11 = por %p105_p7, %p33_p0 }
   0xf   : > { %p1094_p12 = por %p111_p8, %p39_p3  ;;  %s137_s26 = sand.u32 1, %s1004_s14  }
  0x10   : > { %s1255_s24 = scalar_select %p1090_p11, 1, 0 }
  0x11   : > { %s1256_s25 = scalar_select %p1094_p12, 1, 0 }
  0x12   : > { %s845_s27 = sshll.u32 %s1008_s15, 7  ;;  %s826_s28 = sshll.u32 %s137_s26, 3 }
  0x13   : > { %s1103_s4 = scalar_lea.hbm %s1247_s0, %s845_s27  ;;  %s141_s5 = scalar_lea.vmem [#allocation2], %s826_s28 }
  0x14   : > { %s149_s6 = sshll.u32 %s141_s5, 4  ;;  %p1107_p13 = pnand %p859_p10, %p1079_p5  ;;  %s1111_s6 = int_to_ptr.vmem [resolvable:$true] %s149_s6 }
  0x15   : > { %s138_s8 = scalar_lea.sflag [#allocation3], %s137_s26  ;;  %s916_s9 = scalar_lea.hbm %s1103_s4, 128 }
  0x16   : > { %p917_p2 = scmp.ne.s32.totalorder %s1103_s4, %s916_s9  ;;  %p918_p3 = pneg %p1107_p13 }
  0x17   : > { %s921_s17 = scalar_lea.hbm %s1247_s0, 256  ;;  %p922_p5 = scmp.lt.s32.totalorder %s1103_s4, %s1247_s0 }
  0x18   : > { %p919_p4 = pnand %p918_p3, %p917_p2  ;;  %p923_p8 = scmp.lt.s32.totalorder %s921_s17, %s916_s9 }
  0x1a   : > { %p920_p7 = pneg %p919_p4  ;;  %p924_p10 = por %p923_p8, %p922_p5 }
  0x1c   : > { %p925_p9 = pnand %p924_p10, %p920_p7 }
  0x1e   : > { %928 = shalt.err (!%p925_p9)
}
  0x1f   : > { %s929_s22 = scalar_lea.vmem %s1111_s6, 128  ;;  %s1010_s26 = smov [#allocation2]  }
  0x20   : > { %p930_p0 = scmp.ne.s32.totalorder %s1111_s6, %s929_s22  ;;  %s934_s27 = sshll.u32 %s1010_s26, 4  ;;  %s935_s27 = int_to_ptr.vmem [resolvable:$false] %s934_s27 }
  0x21   : > { %s936_s28 = scalar_lea.vmem %s935_s27, 256  ;;  %p937_p4 = scmp.lt.s32.totalorder %s1111_s6, %s935_s27 }
  0x22   : > { %p932_p1 = pnand %p930_p0, %p918_p3  ;;  %p938_p12 = scmp.lt.s32.totalorder %s936_s28, %s929_s22 }
  0x24   : > { %p933_p2 = pneg %p932_p1  ;;  %p939_p11 = por %p938_p12, %p937_p4 }
  0x26   : > { %p940_p6 = pnand %p939_p11, %p933_p2 }
  0x28   : > { %943 = shalt.err (!%p940_p6)
}
  0x29   : > { %854 = dma.hbm_to_vmem [thread:$0]  (!%p1107_p13), %s1103_s4, 128, %s1111_s6, %s138_s8  }
  0x2a   : > { %p1258_p9 = scmp.lt.s32.totalorder %s1008_s15, 3  ;;  %p1259_p7 = scmp.ge.s32.totalorder %s1008_s15, 1 }
  0x2c   : > { %p155_p0 = pnand %p1259_p7, %p1258_p9 }
  0x2d   : > { %s1138_s29 = sand.u32 (!%p155_p0), 1, %s1000_s13   ;;  %p1260_p6 = scmp.ne.s32.totalorder (!%p155_p0), %s1254_s23, 0 }
  0x2e   : > { %158 = sbr.rel (%p155_p0) target bundleno = 463 (0x1cf), region = 32  ;;  %s830_s30 = sshll.u32 (!%p155_p0), %s1138_s29, 3 }
  0x2f   : > { %s161_s5 = scalar_lea.sflag (!%p155_p0), [#allocation3], %s1138_s29  ;;  %s1142_s9 = scalar_lea.vmem (!%p155_p0), [#allocation2], %s830_s30 }
  0x33   : > { %987 = dma.done.wait (%p1260_p6), %s161_s5, 128  }
  0x34   : > { %989 = vsyncadd (%p1260_p6), %s161_s5, 4294967168  ;;  %v1011_v0 = vmov 1   ;;  %v1012_v1 = vmov 0   ;;  %v193_v2 = vld [vmem:[%s1249_s2 + $0x18] sm:$0xff]  ;;  %v192_v3 = vld [vmem:[%s1249_s2 + $0x10] sm:$0xff]  ;;  %v1013_v6 = vmov 2   ;;  %v216_v12 = vlaneseq }
  0x35   : > { %901 = vset.pattern.permute.xlu0 %v1011_v0  ;;  %902 = vset.pattern.permute.xlu1 %v1012_v1  ;;  %v191_v4 = vld [vmem:[%s1249_s2 + $0x8] sm:$0xff]  ;;  %v190_v5 = vld [vmem:[%s1249_s2] sm:$0xff]  ;;  %v1014_v7 = vmov 0.0   ;;  %v1015_v8 = vmov 3   ;;  %v1016_v9 = vmov 4   ;;  %v1017_v10 = vmov 5  }
  0x36   : > { %281 = vperm.xlu0 %901, %v193_v2   ;;  %207 = vperm.xlu1 %902, %v192_v3   ;;  %v194_v11 = vld [vmem:[%s1249_s2] sm:$0x1]  ;;  %v1166_v13 = vshrl.u32 %v216_v12, 7  ;;  %vm420_vm0 = vcmask 261120   ;;  %s831_s6 = sshll.u32 %s1138_s29, 2  ;;  %s846_s7 = sshll.u32 %s1061_s16, 6 }
  0x37   : > { %497 = vmatprep.mubr.f32.mxu0 %v1014_v7  ;;  %586 = vmatprep.mubr.f32.mxu1 %v1014_v7  ;;  %v189_v24 = vld [vmem:[%s1142_s9] sm:$0xff]  ;;  %s186_s8 = scalar_lea.vmem [#allocation5], %s831_s6  ;;  %vm735_vm1 = vcmp.lt.s32.totalorder %v216_v12, 512  ;;  %s751_s17 = scalar_lea.hbm %s1250_s3, %s846_s7 }
  0x38   : > { %v286_v14 = vsub.s32 1, %v1166_v13  ;;  %v294_v15 = vsub.s32 5, %v1166_v13  ;;  %v290_v16 = vsub.s32 3, %v1166_v13  ;;  %v298_v17 = vsub.s32 7, %v1166_v13  ;;  %s753_s10 = sshll.u32 %s186_s8, 4  ;;  %s739_s19 = scalar_lea.sflag [#allocation4], %s1138_s29  ;;  %s754_s10 = int_to_ptr.vmem [resolvable:$true] %s753_s10 }
  0x39   : > { %v218_v18 = vsub.s32 0, %v1166_v13  ;;  %v222_v19 = vsub.s32 2, %v1166_v13  ;;  %v226_v20 = vsub.s32 4, %v1166_v13  ;;  %v230_v21 = vsub.s32 6, %v1166_v13  ;;  %s944_s20 = scalar_lea.vmem %s754_s10, 64  ;;  %p1261_p12 = scmp.ne.s32.totalorder %s1255_s24, 0 }
  0x3a   : > { %903 = vset.pattern.permute.xlu1 %v1011_v0  ;;  %273 = vperm.xlu0 %901, %v191_v4   ;;  %v287_v25 = vrot.slane %v189_v24, %v286_v14  ;;  %v295_v26 = vrot.slane %v189_v24, %v294_v15  ;;  %v291_v27 = vrot.slane %v189_v24, %v290_v16  ;;  %p945_p11 = scmp.ne.s32.totalorder %s754_s10, %s944_s20  ;;  %s1019_s22 = smov [#allocation5]  }
  0x3b   : > { %277 = vperm.xlu1 %903, %v192_v3   ;;  %v299_v28 = vrot.slane %v189_v24, %v298_v17  ;;  %v219_v29 = vrot.slane %v189_v24, %v218_v18  ;;  %v223_v30 = vrot.slane %v189_v24, %v222_v19  ;;  %v227_v31 = vrot.slane %v189_v24, %v226_v20  ;;  %s948_s16 = sshll.u32 %s1019_s22, 4  ;;  %s949_s16 = int_to_ptr.vmem [resolvable:$false] %s948_s16 }
  0x3c   : > { %v231_v32 = vrot.slane %v189_v24, %v230_v21  ;;  %v307_v35 = vrot.slane %v287_v25, %v286_v14  ;;  %v1177_v36 = vrot.slane %v295_v26, %v286_v14  ;;  %v311_v37 = vrot.slane %v291_v27, %v286_v14  ;;  %p946_p13 = pnand %p945_p11, %p1261_p12  ;;  %s950_s26 = scalar_lea.vmem %s949_s16, 128 }
  0x3d   : > { %v319_v38 = vrot.slane %v299_v28, %v286_v14  ;;  %v239_v39 = vrot.slane %v219_v29, %v218_v18  ;;  %v243_v40 = vrot.slane %v223_v30, %v218_v18  ;;  %v247_v41 = vrot.slane %v227_v31, %v218_v18  ;;  %p951_p3 = scmp.lt.s32.totalorder %s754_s10, %s949_s16  ;;  %p952_p5 = scmp.lt.s32.totalorder %s950_s26, %s944_s20 }
  0x3e   : > { %905 = vset.pattern.permute.xlu0 %v1012_v1  ;;  %v251_v42 = vrot.slane %v231_v32, %v218_v18  ;;  %p947_p1 = pneg %p946_p13 }
  0x3f   : > { %904 = vset.pattern.permute.xlu1 %v1012_v1  ;;  %212 = vperm.xlu0 %905, %v193_v2   ;;  %p953_p8 = por %p952_p5, %p951_p3 }
  0x40   : > { %202 = vperm.xlu1 %904, %v191_v4  }
  0x41   : > { %p954_p10 = pnand %p953_p8, %p947_p1 }
  0x43   : > { %197 = vperm.xlu0 %905, %v190_v5  }
  0x44   : > { %906 = vset.pattern.permute.xlu1 %v1013_v6 }
  0x45   : > { %365 = vperm.xlu1 %906, %v193_v2  }
  0x47   : > { %909 = vset.pattern.permute.xlu0 %v1013_v6 }
  0x48   : > { %357 = vperm.xlu0 %909, %v191_v4  }
  0x49   : > { %907 = vset.pattern.permute.xlu1 %v1011_v0 }
  0x4a   : > { %269 = vperm.xlu1 %907, %v190_v5  }
  0x4c   : > { %911 = vset.pattern.permute.xlu0 %v1015_v8 }
  0x4d   : > { %409 = vperm.xlu0 %911, %v191_v4  }
  0x4e   : > { %908 = vset.pattern.permute.xlu1 %v1013_v6 }
  0x4f   : > { %361 = vperm.xlu1 %908, %v192_v3  }
  0x51   : > { %912 = vset.pattern.permute.xlu0 %v1016_v9 }
  0x52   : > { %628 = vperm.xlu0 %912, %v190_v5  }
  0x53   : > { %353 = vperm.xlu1 %908, %v190_v5  }
  0x56   : > { %640 = vperm.xlu0 %912, %v193_v2  }
  0x57   : > { %910 = vset.pattern.permute.xlu1 %v1015_v8 }
  0x58   : > { %405 = vperm.xlu1 %910, %v190_v5  }
  0x5a   : > { %915 = vset.pattern.permute.xlu0 %v1017_v10 }
  0x5c   : > { %413 = vperm.xlu1 %910, %v192_v3  }
  0x60   : > { %417 = vperm.xlu1 %910, %v193_v2  }
  0x64   : > { %913 = vset.pattern.permute.xlu1 %v1016_v9 }
  0x65   : > { %632 = vperm.xlu1 %913, %v191_v4  }
  0x69   : > { %636 = vperm.xlu1 %913, %v192_v3  }
  0x6d   : > { %914 = vset.pattern.permute.xlu1 %v1017_v10 }
  0x6e   : > { %697 = vperm.xlu1 %914, %v194_v11  }
  0xb1   : > { %v208_v22 = vpop.permute.xlu1 %207  ;;  %v282_v23 = vpop.permute.xlu0 %281 }
  0xb2   : > { %v332_v43 = vmul.f32 %v307_v35, %v282_v23  ;;  %v334_v44 = vmul.f32 %v1177_v36, %v282_v23  ;;  %v333_v46 = vmul.f32 %v311_v37, %v282_v23  ;;  %v335_v47 = vmul.f32 %v319_v38, %v282_v23 }
  0xb3   : > { %v260_v53 = vmul.f32 %v239_v39, %v208_v22  ;;  %v261_v17 = vmul.f32 %v243_v40, %v208_v22  ;;  %v263_v18 = vmul.f32 %v251_v42, %v208_v22  ;;  %v262_v21 = vmul.f32 %v247_v41, %v208_v22 }
  0xb5   : > { %v274_v33 = vpop.permute.xlu0 %273 }
  0xb6   : > { %v278_v34 = vpop.permute.xlu1 %277  ;;  %v324_v54 = vmul.f32 %v307_v35, %v274_v33  ;;  %v325_v55 = vmul.f32 %v311_v37, %v274_v33  ;;  %v327_v63 = vmul.f32 %v319_v38, %v274_v33  ;;  %v326_v19 = vmul.f32 %v1177_v36, %v274_v33 }
  0xb7   : > { %v328_v60 = vmul.f32 %v307_v35, %v278_v34  ;;  %v329_v61 = vmul.f32 %v311_v37, %v278_v34  ;;  %v330_v62 = vmul.f32 %v1177_v36, %v278_v34  ;;  %v331_v6 = vmul.f32 %v319_v38, %v278_v34 }
  0xb9   : > { %v345_v24 = vadd.f32 %v329_v61, %v261_v17  ;;  %v347_v25 = vadd.f32 %v331_v6, %v263_v18  ;;  %v344_v26 = vadd.f32 %v328_v60, %v260_v53  ;;  %v346_v28 = vadd.f32 %v330_v62, %v262_v21  ;;  %v400_v6 = vld [vmem:[%s1248_s1] sm:$0xff] }
  0xba   : > { %v213_v45 = vpop.permute.xlu0 %212 }
  0xbb   : > { %v264_v48 = vmul.f32 %v239_v39, %v213_v45  ;;  %v266_v49 = vmul.f32 %v247_v41, %v213_v45  ;;  %v203_v50 = vpop.permute.xlu1 %202  ;;  %v265_v51 = vmul.f32 %v243_v40, %v213_v45  ;;  %v267_v52 = vmul.f32 %v251_v42, %v213_v45 }
  0xbc   : > { %v256_v8 = vmul.f32 %v239_v39, %v203_v50  ;;  %v257_v9 = vmul.f32 %v243_v40, %v203_v50  ;;  %v259_v10 = vmul.f32 %v251_v42, %v203_v50  ;;  %v258_v20 = vmul.f32 %v247_v41, %v203_v50 }
  0xbd   : > { %v349_v56 = vadd.f32 %v333_v46, %v265_v51  ;;  %v351_v57 = vadd.f32 %v335_v47, %v267_v52  ;;  %v348_v58 = vadd.f32 %v332_v43, %v264_v48  ;;  %v350_v59 = vadd.f32 %v334_v44, %v266_v49 }
  0xbe   : > { %v198_v1 = vpop.permute.xlu0 %197  ;;  %v341_v29 = vadd.f32 %v325_v55, %v257_v9  ;;  %v343_v30 = vadd.f32 %v327_v63, %v259_v10  ;;  %v340_v31 = vadd.f32 %v324_v54, %v256_v8  ;;  %v342_v44 = vadd.f32 %v326_v19, %v258_v20  ;;  %v401_v8 = vld [vmem:[%s1248_s1 + $0x8] sm:$0xff]  ;;  %v402_v9 = vld [vmem:[%s1248_s1 + $0x10] sm:$0xff]  ;;  %v403_v10 = vld [vmem:[%s1248_s1 + $0x18] sm:$0xff] }
  0xbf   : > { %v252_v33 = vmul.f32 %v239_v39, %v198_v1  ;;  %v253_v45 = vmul.f32 %v243_v40, %v198_v1  ;;  %v254_v22 = vmul.f32 %v247_v41, %v198_v1  ;;  %v255_v46 = vmul.f32 %v251_v42, %v198_v1 }
  0xc0   : > { %v366_v0 = vpop.permute.xlu1 %365 }
  0xc1   : > { %v381_v2 = vadd.f32 %v366_v0, %v349_v56  ;;  %v383_v3 = vadd.f32 %v366_v0, %v351_v57  ;;  %v380_v4 = vadd.f32 %v366_v0, %v348_v58  ;;  %v382_v5 = vadd.f32 %v366_v0, %v350_v59 }
  0xc3   : > { %v397_v11 = vmax.f32 %v381_v2, 0.0  ;;  %v399_v14 = vmax.f32 %v383_v3, 0.0  ;;  %v396_v15 = vmax.f32 %v380_v4, 0.0  ;;  %v398_v16 = vmax.f32 %v382_v5, 0.0  ;;  %v358_v27 = vpop.permute.xlu0 %357 }
  0xc4   : > { %v373_v49 = vadd.f32 %v358_v27, %v341_v29  ;;  %v375_v50 = vadd.f32 %v358_v27, %v343_v30  ;;  %v372_v51 = vadd.f32 %v358_v27, %v340_v31  ;;  %v374_v57 = vadd.f32 %v358_v27, %v342_v44 }
  0xc5   : > { %v270_v23 = vpop.permute.xlu1 %269  ;;  %457 = vmatprep.subr.mxu0 %v397_v11  ;;  %546 = vmatprep.subr.mxu1 %v399_v14 }
  0xc6   : > { %458 = vmatpush1.msra.mxu0 %v396_v15  ;;  %547 = vmatpush1.msra.mxu1 %v398_v16  ;;  %v320_v32 = vmul.f32 %v307_v35, %v270_v23  ;;  %v321_v34 = vmul.f32 %v311_v37, %v270_v23  ;;  %v323_v43 = vmul.f32 %v319_v38, %v270_v23  ;;  %v389_v42 = vmax.f32 %v373_v49, 0.0 }
  0xc7   : > { %v322_v47 = vmul.f32 %v1177_v36, %v270_v23  ;;  %v391_v36 = vmax.f32 %v375_v50, 0.0  ;;  %v388_v63 = vmax.f32 %v372_v51, 0.0  ;;  %v390_v0 = vmax.f32 %v374_v57, 0.0 }
  0xc8   : > { %v337_v54 = vadd.f32 %v321_v34, %v253_v45  ;;  %v339_v35 = vadd.f32 %v323_v43, %v255_v46  ;;  %v336_v37 = vadd.f32 %v320_v32, %v252_v33  ;;  %v410_v18 = vpop.permute.xlu0 %409 }
  0xc9   : > { %v338_v59 = vadd.f32 %v322_v47, %v254_v22 }
  0xca   : > { %v362_v48 = vpop.permute.xlu1 %361 }
  0xcb   : > { %v377_v52 = vadd.f32 %v362_v48, %v345_v24  ;;  %v379_v53 = vadd.f32 %v362_v48, %v347_v25  ;;  %v376_v56 = vadd.f32 %v362_v48, %v344_v26  ;;  %v378_v55 = vadd.f32 %v362_v48, %v346_v28 }
  0xcd   : > { %v393_v38 = vmax.f32 %v377_v52, 0.0  ;;  %v395_v58 = vmax.f32 %v379_v53, 0.0  ;;  %v392_v39 = vmax.f32 %v376_v56, 0.0  ;;  %v394_v40 = vmax.f32 %v378_v55, 0.0  ;;  %v629_v43 = vpop.permute.xlu0 %628 }
  0xce   : > { %v354_v41 = vpop.permute.xlu1 %353 }
  0xcf   : > { %459 = vmatprep.subr.mxu0 %v393_v38  ;;  %548 = vmatprep.subr.mxu1 %v395_v58  ;;  %v369_v60 = vadd.f32 %v354_v41, %v337_v54  ;;  %v371_v61 = vadd.f32 %v354_v41, %v339_v35  ;;  %v368_v62 = vadd.f32 %v354_v41, %v336_v37 }
  0xd0   : > { %460 = vmatpush1.msra.mxu0 %v392_v39  ;;  %549 = vmatpush1.msra.mxu1 %v394_v40  ;;  %v370_v1 = vadd.f32 %v354_v41, %v338_v59 }
  0xd1   : > { %461 = vmatprep.subr.mxu0 %v389_v42  ;;  %550 = vmatprep.subr.mxu1 %v391_v36  ;;  %v385_v2 = vmax.f32 %v369_v60, 0.0  ;;  %v387_v3 = vmax.f32 %v371_v61, 0.0  ;;  %v384_v4 = vmax.f32 %v368_v62, 0.0 }
  0xd2   : > { %462 = vmatpush1.msra.mxu0 %v388_v63  ;;  %551 = vmatpush1.msra.mxu1 %v390_v0  ;;  %v386_v5 = vmax.f32 %v370_v1, 0.0 }
  0xd3   : > { %463 = vmatprep.subr.mxu0 %v385_v2  ;;  %552 = vmatprep.subr.mxu1 %v387_v3  ;;  %v406_v11 = vpop.permute.xlu1 %405 }
  0xd4   : > { %464 = vmatpush1.msra.mxu0 %v384_v4  ;;  %553 = vmatpush1.msra.mxu1 %v386_v5 }
  0xd5   : > { %832 = vmatmul.mubr.msk.f32.vlgmr.msra.gmra.mxu0 %vm420_vm0, %v400_v6  ;;  %836 = vmatmul.mubr.msk.f32.vlgmr.msra.gmra.mxu1 %vm420_vm0, %v400_v6 }
  0xd6   : > { %503 = vmatprep.mubr.f32.mxu0 %v1014_v7  ;;  %592 = vmatprep.mubr.f32.mxu1 %v1014_v7 }
  0xd7   : > { %v414_v14 = vpop.permute.xlu1 %413 }
  0xd9   : > { %833 = vmatmul.mubr.msk.f32.gmra.mxu0 %vm420_vm0, %v401_v8  ;;  %837 = vmatmul.mubr.msk.f32.gmra.mxu1 %vm420_vm0, %v401_v8 }
  0xda   : > { %509 = vmatprep.mubr.f32.mxu0 %v1014_v7  ;;  %598 = vmatprep.mubr.f32.mxu1 %v1014_v7 }
  0xdb   : > { %v418_v15 = vpop.permute.xlu1 %417 }
  0xdd   : > { %834 = vmatmul.mubr.msk.f32.gmra.mxu0 %vm420_vm0, %v402_v9  ;;  %838 = vmatmul.mubr.msk.f32.gmra.mxu1 %vm420_vm0, %v402_v9 }
  0xde   : > { %515 = vmatprep.mubr.f32.mxu0 %v1014_v7  ;;  %604 = vmatprep.mubr.f32.mxu1 %v1014_v7 }
  0xe0   : > { %v633_v24 = vpop.permute.xlu1 %632 }
  0xe1   : > { %835 = vmatmul.mubr.msk.f32.gmra.mxu0 %vm420_vm0, %v403_v10  ;;  %839 = vmatmul.mubr.msk.f32.gmra.mxu1 %vm420_vm0, %v403_v10 }
  0xe4   : > { %v637_v56 = vpop.permute.xlu1 %636 }
 0x195   : > { %v499_v16 = vpop.f32.mrf.mxu0  ;;  %v588_v17 = vpop.f32.mrf.mxu1 }
 0x196   : > { %v500_v19 = vadd.f32 %v499_v16, %v406_v11  ;;  %v589_v20 = vadd.f32 %v588_v17, %v406_v11 }
 0x197   : > { %v501_v21 = vpop.f32.mrf.mxu0  ;;  %v590_v23 = vpop.f32.mrf.mxu1 }
 0x198   : > { %v502_v7 = vadd.f32 %v501_v21, %v406_v11  ;;  %v591_v25 = vadd.f32 %v590_v23, %v406_v11  ;;  %v611_v28 = vmax.f32 %v500_v19, 0.0  ;;  %v613_v29 = vmax.f32 %v589_v20, 0.0  ;;  %v641_v21 = vpop.permute.xlu0 %640 }
 0x199   : > { %v505_v26 = vpop.f32.mrf.mxu0  ;;  %v594_v27 = vpop.f32.mrf.mxu1 }
 0x19a   : > { %v506_v30 = vadd.f32 %v505_v26, %v410_v18  ;;  %v595_v31 = vadd.f32 %v594_v27, %v410_v18  ;;  %v612_v45 = vmax.f32 %v502_v7, 0.0  ;;  %v614_v22 = vmax.f32 %v591_v25, 0.0 }
 0x19b   : > { %v507_v32 = vpop.f32.mrf.mxu0  ;;  %v596_v34 = vpop.f32.mrf.mxu1  ;;  %v643_v55 = vmul.f32 %v629_v43, %v611_v28  ;;  %v645_v57 = vmul.f32 %v629_v43, %v613_v29 }
 0x19c   : > { %v508_v44 = vadd.f32 %v507_v32, %v410_v18  ;;  %v597_v33 = vadd.f32 %v596_v34, %v410_v18  ;;  %v615_v46 = vmax.f32 %v506_v30, 0.0  ;;  %v617_v47 = vmax.f32 %v595_v31, 0.0 }
 0x19d   : > { %v511_v48 = vpop.f32.mrf.mxu0  ;;  %v600_v49 = vpop.f32.mrf.mxu1  ;;  %v644_v40 = vmul.f32 %v629_v43, %v612_v45  ;;  %v646_v41 = vmul.f32 %v629_v43, %v614_v22 }
 0x19e   : > { %v616_v50 = vmax.f32 %v508_v44, 0.0  ;;  %v618_v51 = vmax.f32 %v597_v33, 0.0  ;;  %v512_v52 = vadd.f32 %v511_v48, %v414_v14  ;;  %v601_v53 = vadd.f32 %v600_v49, %v414_v14 }
 0x19f   : > { %v513_v54 = vpop.f32.mrf.mxu0  ;;  %v602_v35 = vpop.f32.mrf.mxu1  ;;  %v647_v37 = vmul.f32 %v633_v24, %v615_v46  ;;  %v649_v38 = vmul.f32 %v633_v24, %v617_v47 }
 0x1a0   : > { %v619_v58 = vmax.f32 %v512_v52, 0.0  ;;  %v621_v39 = vmax.f32 %v601_v53, 0.0  ;;  %v514_v42 = vadd.f32 %v513_v54, %v414_v14  ;;  %v603_v59 = vadd.f32 %v602_v35, %v414_v14 }
 0x1a1   : > { %v517_v36 = vpop.f32.mrf.mxu0  ;;  %v606_v60 = vpop.f32.mrf.mxu1  ;;  %v648_v61 = vmul.f32 %v633_v24, %v616_v50  ;;  %v650_v62 = vmul.f32 %v633_v24, %v618_v51  ;;  %v659_v8 = vadd.f32 %v647_v37, %v643_v55  ;;  %v677_v9 = vadd.f32 %v649_v38, %v645_v57 }
 0x1a2   : > { %v651_v63 = vmul.f32 %v637_v56, %v619_v58  ;;  %v653_v0 = vmul.f32 %v637_v56, %v621_v39  ;;  %v620_v1 = vmax.f32 %v514_v42, 0.0  ;;  %v622_v2 = vmax.f32 %v603_v59, 0.0  ;;  %v698_v42 = vpop.permute.xlu1 %697 }
 0x1a3   : > { %v518_v3 = vadd.f32 %v517_v36, %v418_v15  ;;  %v607_v4 = vadd.f32 %v606_v60, %v418_v15  ;;  %v519_v5 = vpop.f32.mrf.mxu0  ;;  %v608_v6 = vpop.f32.mrf.mxu1  ;;  %v668_v19 = vadd.f32 %v648_v61, %v644_v40  ;;  %v686_v20 = vadd.f32 %v650_v62, %v646_v41 }
 0x1a4   : > { %v520_v10 = vadd.f32 %v519_v5, %v418_v15  ;;  %v609_v11 = vadd.f32 %v608_v6, %v418_v15  ;;  %v652_v16 = vmul.f32 %v637_v56, %v620_v1  ;;  %v654_v17 = vmul.f32 %v637_v56, %v622_v2 }
 0x1a5   : > { %v623_v18 = vmax.f32 %v518_v3, 0.0  ;;  %v625_v14 = vmax.f32 %v607_v4, 0.0  ;;  %v660_v26 = vadd.f32 %v659_v8, %v651_v63  ;;  %v678_v27 = vadd.f32 %v677_v9, %v653_v0 }
 0x1a6   : > { %v624_v23 = vmax.f32 %v520_v10, 0.0  ;;  %v626_v24 = vmax.f32 %v609_v11, 0.0  ;;  %v669_v29 = vadd.f32 %v668_v19, %v652_v16  ;;  %v687_v31 = vadd.f32 %v686_v20, %v654_v17 }
 0x1a7   : > { %v655_v7 = vmul.f32 %v641_v21, %v623_v18  ;;  %v657_v25 = vmul.f32 %v641_v21, %v625_v14  ;;  %v1018_v50 = vmov 1966171168  }
 0x1a8   : > { %v656_v28 = vmul.f32 %v641_v21, %v624_v23  ;;  %v658_v30 = vmul.f32 %v641_v21, %v626_v24  ;;  %v711_v51 = vunpack.c.l.s4 %v1018_v50 }
 0x1a9   : > { %v661_v32 = vadd.f32 %v660_v26, %v655_v7  ;;  %v679_v34 = vadd.f32 %v678_v27, %v657_v25 }
 0x1aa   : > { %v670_v15 = vadd.f32 %v669_v29, %v656_v28  ;;  %v688_v43 = vadd.f32 %v687_v31, %v658_v30  ;;  %v712_v38 = vunpack.c.0.s8 %v711_v51 }
 0x1ab   : > { %v662_v44 = vrot.slane %v661_v32, 4  ;;  %v680_v33 = vrot.slane %v679_v34, 4 }
 0x1ac   : > { %v671_v45 = vrot.slane %v670_v15, 4  ;;  %v689_v22 = vrot.slane %v688_v43, 4  ;;  %v715_v62 = vsub.s32 %v712_v38, %v1166_v13 }
 0x1ad   : > { %v663_v46 = vadd.f32 %v662_v44, %v661_v32  ;;  %v681_v47 = vadd.f32 %v680_v33, %v679_v34 }
 0x1ae   : > { %v672_v48 = vadd.f32 %v671_v45, %v670_v15  ;;  %v690_v49 = vadd.f32 %v689_v22, %v688_v43 }
 0x1af   : > { %v664_v52 = vrot.slane %v663_v46, 2  ;;  %v682_v53 = vrot.slane %v681_v47, 2 }
 0x1b0   : > { %v673_v56 = vrot.slane %v672_v48, 2  ;;  %v691_v55 = vrot.slane %v690_v49, 2 }
 0x1b1   : > { %v665_v57 = vadd.f32 %v664_v52, %v663_v46  ;;  %v683_v54 = vadd.f32 %v682_v53, %v681_v47 }
 0x1b2   : > { %v674_v35 = vadd.f32 %v673_v56, %v672_v48  ;;  %v692_v37 = vadd.f32 %v691_v55, %v690_v49 }
 0x1b3   : > { %v666_v58 = vrot.slane %v665_v57, 1  ;;  %v684_v39 = vrot.slane %v683_v54, 1 }
 0x1b4   : > { %v675_v40 = vrot.slane %v674_v35, 1  ;;  %v693_v41 = vrot.slane %v692_v37, 1 }
 0x1b5   : > { %v667_v59 = vadd.f32 %v666_v58, %v665_v57  ;;  %v685_v36 = vadd.f32 %v684_v39, %v683_v54 }
 0x1b6   : > { %v676_v60 = vadd.f32 %v675_v40, %v674_v35  ;;  %v694_v61 = vadd.f32 %v693_v41, %v692_v37 }
 0x1b7   : > { %v700_v63 = vadd.f32 %v698_v42, %v667_v59  ;;  %v702_v1 = vadd.f32 %v698_v42, %v685_v36 }
 0x1b8   : > { %v701_v0 = vadd.f32 %v698_v42, %v676_v60  ;;  %v703_v2 = vadd.f32 %v698_v42, %v694_v61 }
 0x1ba   : > { %v708_v3 = vcombine.low %v700_v63, %v701_v0  ;;  %v709_v4 = vcombine.low %v702_v1, %v703_v2 }
 0x1bc   : > { %v716_v5 = vrot.slane %v708_v3, %v715_v62  ;;  %v723_v6 = vrot.slane %v709_v4, %v715_v62 }
 0x1be   : > { %v724_v8 = vcombine.low %v716_v5, %v723_v6 }
 0x1c0   : > { %v731_v9 = vrot.slane %v724_v8, %v715_v62 }
 0x1c2   : > { %737 = vst.msk [vmem:[%s186_s8] sm:$0xf] %vm735_vm1, %v731_v9 }
 0x1c3   : > { %957 = shalt.err (!%p954_p10)
}
 0x1c4   : > { %s958_s27 = scalar_lea.hbm %s751_s17, 64  ;;  %s962_s30 = scalar_lea.hbm %s1250_s3, 128 }
 0x1c5   : > { %p959_p2 = scmp.ne.s32.totalorder %s751_s17, %s958_s27  ;;  %p963_p7 = scmp.lt.s32.totalorder %s751_s17, %s1250_s3 }
 0x1c6   : > { %p964_p0 = scmp.lt.s32.totalorder %s962_s30, %s958_s27 }
 0x1c7   : > { %p960_p4 = pnand %p959_p2, %p1261_p12 }
 0x1c8   : > { %p965_p6 = por %p964_p0, %p963_p7 }
 0x1c9   : > { %p961_p9 = pneg %p960_p4 }
 0x1cb   : > { %p966_p11 = pnand %p965_p6, %p961_p9 }
 0x1cd   : > { %969 = shalt.err (!%p966_p11)
}
 0x1ce   : > { %849 = dma.vmem_to_hbm [thread:$0]  (%p1261_p12), %s754_s10, 64, %s751_s17, %s739_s19  }
 0x1cf PF: > { %s765_s4 = sand.u32 1, %s996_s12   ;;  %p1262_p13 = scmp.ne.s32.totalorder %s1256_s25, 0 }
 0x1d0   : > { %p1263_p1 = scmp.ge.s32.totalorder %s1008_s15, 2  ;;  %s766_s6 = scalar_lea.sflag [#allocation4], %s765_s4 }
 0x1d2   : > { %p856_p3 = pnand %p1263_p1, %p1262_p13 }
 0x1d4   : > { %p857_p5 = pneg %p856_p3 }
 0x1d6   : > { %991 = dma.done.wait (%p857_p5), %s766_s6, 64  }
 0x1d7   : > { %993 = vsyncadd (%p857_p5), %s766_s6, 4294967232  ;;  %p16_p8 = scmp.ge.s32.totalorder %s1065_s18, 4   ;;  %s1264_s12 = smov %s1000_s13 }
 0x1d8   : > { %s1265_s13 = smov %s1004_s14  ;;  %s1266_s14 = smov %s1077_s21 }
 0x1d9   : > { %s1267_s15 = smov %s1065_s18  ;;  %18 = sbr.rel (!%p16_p8) target bundleno = 5 (0x5), region = 77 }
 0x1de   :  { %771 = vsyncpa [#allocation3], 1 }
 0x1df   :  { %773 = vsyncpa [#allocation3 + $0x1], 1 }
 0x1e0   :  { %774 = vsyncpa [#allocation4], 1 }
 0x1e1   :  { %776 = vsyncpa [#allocation4 + $0x1], 1 }

</bundles_post_ra>
